<compile_context>
chip_gen: v6e
topology: v6e:2x2x1
jax: 0.10.0
libtpu: 0.0.40
codegen_flags: <defaults>
</compile_context>

<pallas_src>
import functools

import jax
import jax.numpy as jnp
from jax.experimental import pallas as pl
from jax.experimental.pallas import tpu as pltpu


def _cbam_kernel(x_ref, w1_ref, w2_ref, masks_ref, cw_ref, cb_ref, o_ref,
                 *, K, P, W, C, Bt):
    """Bt batch samples per grid step, channels folded onto sublanes.

    x_ref    : (Bt*C, H*W)  VMEM lane/sublane-dense input tile (row = b*C + c)
    w1_ref   : (Cr, C+1)    VMEM fc1 weight with bias folded into last column
    w2_ref   : (C, Cr+1)    VMEM fc2 weight with bias folded into last column
    masks_ref: (K*K, H*W)   VMEM precomputed 0/1 zero-padding masks, one/tap
    cw_ref   : (2*K*K,)     SMEM spatial conv weight [avg taps | max taps]
    cb_ref   : (1,)         SMEM spatial conv bias
    o_ref    : (Bt*C, H*W)  VMEM output tile
    """
    HW = x_ref.shape[1]
    KK = K * K

    x = x_ref[...].astype(jnp.float32)                     # (Bt*C, HW)

    # ---------------- channel attention (batched MXU MLP) ----------------
    # Global average / max pooling at full 8-sublane occupancy.
    avg = jnp.mean(x, axis=1, keepdims=True)               # (Bt*C, 1)
    mx = jnp.max(x, axis=1, keepdims=True)                 # (Bt*C, 1)

    # pooled columns: [avg_0 .. avg_{Bt-1} | max_0 .. max_{Bt-1}] -> (C, 2*Bt)
    cols = ([avg[b * C:(b + 1) * C, :] for b in range(Bt)]
            + [mx[b * C:(b + 1) * C, :] for b in range(Bt)])
    pooled = jnp.concatenate(cols, axis=1)                  # (C, 2*Bt)

    ones_row = jnp.ones((1, 2 * Bt), jnp.float32)
    pooled_aug = jnp.concatenate([pooled, ones_row], axis=0)    # (C+1, 2*Bt)

    h = jnp.dot(w1_ref[...], pooled_aug,
                preferred_element_type=jnp.float32)         # (Cr, 2*Bt) + b1
    h = jnp.maximum(h, 0.0)                                 # ReLU
    h_aug = jnp.concatenate([h, ones_row], axis=0)          # (Cr+1, 2*Bt)
    z = jnp.dot(w2_ref[...], h_aug,
                preferred_element_type=jnp.float32)         # (C, 2*Bt) + b2

    # avg-path + max-path (fc2 bias counted twice, as in the PyTorch module).
    ca = jax.nn.sigmoid(z[:, :Bt] + z[:, Bt:])              # (C, Bt)

    # Channel gate as a (Bt*C, 1) sublane column aligned with x's row order.
    ca_col = jnp.concatenate([ca[:, b:b + 1] for b in range(Bt)], axis=0)
    xc = x * ca_col                                         # (Bt*C, HW)

    # ---------------- spatial attention ----------------
    # Per-sample channel mean / max, stacked so the tap loop runs once on
    # (Bt, HW) tiles instead of per (1, HW) row.
    s_avg = jnp.concatenate(
        [jnp.mean(xc[b * C:(b + 1) * C, :], axis=0, keepdims=True)
         for b in range(Bt)], axis=0)                       # (Bt, HW)
    s_max = jnp.concatenate(
        [jnp.max(xc[b * C:(b + 1) * C, :], axis=0, keepdims=True)
         for b in range(Bt)], axis=0)                       # (Bt, HW)

    masks = masks_ref[...]                                  # (K*K, HW), 0/1 f32

    # KxK cross-correlation on the flattened maps: per tap combine the two
    # pooled maps with their scalar weights, one XLU lane rotation, then a
    # single multiply by the precomputed zero-padding mask.
    acc = jnp.zeros((Bt, HW), jnp.float32)
    for kh in range(K):
        dh = kh - P
        for kw in range(K):
            dw = kw - P
            tap = kh * K + kw
            d = dh * W + dw                                 # flat source offset
            combined = cw_ref[tap] * s_avg + cw_ref[KK + tap] * s_max
            if d != 0:
                # out[p] = combined[p + d]  (pad positions zeroed by the mask)
                combined = pltpu.roll(combined, (-d) % HW, axis=1)
            acc = acc + combined * masks[tap:tap + 1, :]
    sa = jax.nn.sigmoid(acc + cb_ref[0])                    # (Bt, HW)

    out = jnp.concatenate(
        [xc[b * C:(b + 1) * C, :] * sa[b:b + 1, :] for b in range(Bt)],
        axis=0)                                             # (Bt*C, HW)
    o_ref[...] = out.astype(o_ref.dtype)                    # lane-dense store


def _pick_bt(B, C, HW, itemsize=4, block_budget_bytes=2 * 1024 * 1024):
    """Largest divisor of B whose block fits the budget, preferring Bt*C % 8 == 0."""
    divisors = [d for d in range(1, B + 1) if B % d == 0]
    fitting = [d for d in divisors if d * C * HW * itemsize <= block_budget_bytes]
    if not fitting:
        return 1
    aligned = [d for d in fitting if (d * C) % 8 == 0]
    return max(aligned) if aligned else max(fitting)


def cbam_forward(x, params, kernel_size):
    w1, b1, w2, b2, conv_w, conv_b = params
    B, C, H, W = x.shape
    Cr = w1.shape[0]
    K = kernel_size
    P = K // 2
    HW = H * W
    KK = K * K

    # Fold biases into augmented weight matrices (ones-row trick).
    w1_aug = jnp.concatenate([w1, b1.reshape(-1, 1)], axis=1)   # (Cr, C+1)
    w2_aug = jnp.concatenate([w2, b2.reshape(-1, 1)], axis=1)   # (C, Cr+1)

    # Precompute the K*K zero-padding masks over the flattened spatial layout.
    lane = jnp.arange(HW)
    wi = lane % W
    hi = lane // W
    mask_rows = []
    for kh in range(K):
        dh = kh - P
        for kw in range(K):
            dw = kw - P
            valid = ((wi + dw >= 0) & (wi + dw < W) &
                     (hi + dh >= 0) & (hi + dh < H))
            mask_rows.append(valid.astype(jnp.float32))
    masks = jnp.stack(mask_rows, axis=0)                         # (K*K, HW)

    conv_w_flat = conv_w.reshape(-1)                             # (2*K*K,)

    Bt = _pick_bt(B, C, HW)
    grid = B // Bt

    x_flat = x.reshape(B * C, HW)                                # lane-dense
    kern = functools.partial(_cbam_kernel, K=K, P=P, W=W, C=C, Bt=Bt)

    flops = int(B * (2 * 2 * (Cr * (C + 1) + C * (Cr + 1))       # MLP (2 paths)
                     + KK * 6 * HW                               # tap loop
                     + 10 * C * HW))                             # pool + gating
    transcendentals = int(B * (C + HW))                          # sigmoids
    bytes_accessed = int(2 * B * C * HW * 4
                         + 4 * (Cr * (C + 1) + C * (Cr + 1)
                                + KK * HW + 2 * KK + 1))

    out_flat = pl.pallas_call(
        kern,
        out_shape=jax.ShapeDtypeStruct((B * C, HW), x.dtype),
        grid=(grid,),
        in_specs=[
            pl.BlockSpec((Bt * C, HW), lambda g: (g, 0)),         # x tile
            pl.BlockSpec((Cr, C + 1), lambda g: (0, 0)),          # fc1 (w|b)
            pl.BlockSpec((C, Cr + 1), lambda g: (0, 0)),          # fc2 (w|b)
            pl.BlockSpec((KK, HW), lambda g: (0, 0)),             # pad masks
            pl.BlockSpec(memory_space=pltpu.MemorySpace.SMEM),    # conv w (flat)
            pl.BlockSpec(memory_space=pltpu.MemorySpace.SMEM),    # conv b
        ],
        out_specs=pl.BlockSpec((Bt * C, HW), lambda g: (g, 0)),
        compiler_params=pltpu.CompilerParams(
            dimension_semantics=("parallel",),   # batch groups are independent
            vmem_limit_bytes=32 * 1024 * 1024),
        cost_estimate=pl.CostEstimate(
            flops=flops, transcendentals=transcendentals,
            bytes_accessed=bytes_accessed),
    )(x_flat, w1_aug, w2_aug, masks, conv_w_flat, conv_b)

    return out_flat.reshape(B, C, H, W)


def cbam_reference(x, params, kernel_size):
    """Pure-JAX reference matching the PyTorch forward semantics."""
    w1, b1, w2, b2, conv_w, conv_b = params
    B, C, H, W = x.shape
    K = kernel_size
    P = K // 2

    avg = jnp.mean(x, axis=(2, 3))                          # (B, C)
    mx = jnp.max(x, axis=(2, 3))                            # (B, C)

    def mlp(p):                                             # (B, C)
        h = jnp.maximum(p @ w1.T + b1[:, 0], 0.0)           # (B, Cr)
        return h @ w2.T + b2[:, 0]                          # (B, C)

    ca = jax.nn.sigmoid(mlp(avg) + mlp(mx))                 # (B, C)
    xc = x * ca[:, :, None, None]

    s_avg = jnp.mean(xc, axis=1, keepdims=True)             # (B, 1, H, W)
    s_max = jnp.max(xc, axis=1, keepdims=True)              # (B, 1, H, W)
    s = jnp.concatenate([s_avg, s_max], axis=1)             # (B, 2, H, W)

    w = conv_w.reshape(1, 2, K, K)
    conv = jax.lax.conv_general_dilated(
        s, w, window_strides=(1, 1), padding=[(P, P), (P, P)],
        dimension_numbers=("NCHW", "OIHW", "NCHW")) + conv_b[0]
    sa = jax.nn.sigmoid(conv)                               # (B, 1, H, W)
    return xc * sa


if __name__ == "__main__":
    # CBAM_Module(dim=2, in_channels=4, ratio=2, kernel_size=3)
    B, C, H, W = 2, 4, 16, 16
    ratio = 2
    K = 3
    Cr = C // ratio

    key = jax.random.PRNGKey(0)
    kx, k1, k2, k3, k4, k5, k6 = jax.random.split(key, 7)

    x = jax.random.normal(kx, (B, C, H, W), dtype=jnp.float32)

    # Deterministic synthetic parameters (shapes from the module's __init__).
    w1 = jax.random.normal(k1, (Cr, C), dtype=jnp.float32) * 0.5          # fc1 w
    b1 = jax.random.normal(k2, (Cr, 1), dtype=jnp.float32) * 0.1          # fc1 b
    w2 = jax.random.normal(k3, (C, Cr), dtype=jnp.float32) * 0.5          # fc2 w
    b2 = jax.random.normal(k4, (C, 1), dtype=jnp.float32) * 0.1           # fc2 b
    conv_w = jax.random.normal(k5, (2, K * K), dtype=jnp.float32) * 0.5   # spatial w
    conv_b = jax.random.normal(k6, (1,), dtype=jnp.float32) * 0.1         # spatial b

    params = (w1, b1, w2, b2, conv_w, conv_b)

    out = cbam_forward(x, params, kernel_size=K)
    out = jax.block_until_ready(out)

    ref = jax.block_until_ready(cbam_reference(x, params, kernel_size=K))
    err = float(jnp.max(jnp.abs(out - ref)))
    assert err < 1e-4, f"mismatch vs reference: max abs err = {err}"

    print("KERNEL_OK")
</pallas_src>

<mosaic_0001>
module attributes {stable_mosaic.version = 11 : i64} {
  func.func @_cbam_kernel(%arg0: i32, %arg1: memref<8x256xf32, #tpu.memory_space<vmem>>, %arg2: memref<2x5xf32, #tpu.memory_space<vmem>>, %arg3: memref<4x3xf32, #tpu.memory_space<vmem>>, %arg4: memref<9x256xf32, #tpu.memory_space<vmem>>, %arg5: memref<18xf32, #tpu.memory_space<smem>>, %arg6: memref<1xf32, #tpu.memory_space<smem>>, %arg7: memref<8x256xf32, #tpu.memory_space<vmem>>) attributes {dimension_semantics = [#tpu.dimension_semantics<parallel>], iteration_bounds = array<i64: 1>, scalar_prefetch = 0 : i64, scratch_operands = 0 : i64, tpu.core_type = #tpu.core_type<tc>, window_params = [{transform_indices = @transform_0, window_bounds = array<i64: 8, 256>}, {pipeline_mode = #tpu.pipeline_mode<synchronous>, transform_indices = @transform_1, window_bounds = array<i64: 2, 5>}, {pipeline_mode = #tpu.pipeline_mode<synchronous>, transform_indices = @transform_2, window_bounds = array<i64: 4, 3>}, {pipeline_mode = #tpu.pipeline_mode<synchronous>, transform_indices = @transform_3, window_bounds = array<i64: 9, 256>}, {transform_indices = @transform_4, window_bounds = array<i64: 18>}, {transform_indices = @transform_5, window_bounds = array<i64: 1>}, {transform_indices = @transform_6, window_bounds = array<i64: 8, 256>}]} {
    %c0 = arith.constant 0 : index
    %c0_0 = arith.constant 0 : index
    %0 = vector.load %arg1[%c0, %c0_0] : memref<8x256xf32, #tpu.memory_space<vmem>>, vector<8x256xf32>
    %cst = arith.constant dense<0.000000e+00> : vector<8xf32>
    %1 = vector.multi_reduction <add>, %0, %cst [1] : vector<8x256xf32> to vector<8xf32>
    %2 = vector.shape_cast %1 : vector<8xf32> to vector<8x1xf32>
    %cst_1 = arith.constant 2.560000e+02 : f32
    %3 = vector.broadcast %cst_1 : f32 to vector<8x1xf32>
    %4 = arith.divf %2, %3 : vector<8x1xf32>
    %cst_2 = arith.constant dense<0xFF800000> : vector<8xf32>
    %5 = vector.multi_reduction <maximumf>, %0, %cst_2 [1] : vector<8x256xf32> to vector<8xf32>
    %6 = vector.shape_cast %5 : vector<8xf32> to vector<8x1xf32>
    %7 = vector.extract_strided_slice %4 {offsets = [0, 0], sizes = [4, 1], strides = [1, 1]} : vector<8x1xf32> to vector<4x1xf32>
    %8 = vector.extract_strided_slice %4 {offsets = [4, 0], sizes = [4, 1], strides = [1, 1]} : vector<8x1xf32> to vector<4x1xf32>
    %9 = vector.extract_strided_slice %6 {offsets = [0, 0], sizes = [4, 1], strides = [1, 1]} : vector<8x1xf32> to vector<4x1xf32>
    %10 = vector.extract_strided_slice %6 {offsets = [4, 0], sizes = [4, 1], strides = [1, 1]} : vector<8x1xf32> to vector<4x1xf32>
    %11 = tpu.concatenate %7, %8, %9, %10 in 1 : vector<4x1xf32>, vector<4x1xf32>, vector<4x1xf32>, vector<4x1xf32> -> vector<4x4xf32>
    %cst_3 = arith.constant 1.000000e+00 : f32
    %12 = vector.broadcast %cst_3 : f32 to vector<1x4xf32>
    %13 = tpu.concatenate %11, %12 in 0 : vector<4x4xf32>, vector<1x4xf32> -> vector<5x4xf32>
    %c0_4 = arith.constant 0 : index
    %c0_5 = arith.constant 0 : index
    %14 = vector.load %arg2[%c0_4, %c0_5] : memref<2x5xf32, #tpu.memory_space<vmem>>, vector<2x5xf32>
    %cst_6 = arith.constant dense<0.000000e+00> : vector<2x4xf32>
    %15 = tpu.matmul %14, %13, %cst_6 {dimension_numbers = #tpu.dot_dimension_numbers<[1], [0], [0], [1], [0, 0, 1, 1], [], []>} : vector<2x5xf32>, vector<5x4xf32>, vector<2x4xf32> -> vector<2x4xf32>
    %cst_7 = arith.constant 0.000000e+00 : f32
    %16 = vector.broadcast %cst_7 : f32 to vector<2x4xf32>
    %17 = arith.maximumf %15, %16 : vector<2x4xf32>
    %18 = tpu.concatenate %17, %12 in 0 : vector<2x4xf32>, vector<1x4xf32> -> vector<3x4xf32>
    %c0_8 = arith.constant 0 : index
    %c0_9 = arith.constant 0 : index
    %19 = vector.load %arg3[%c0_8, %c0_9] : memref<4x3xf32, #tpu.memory_space<vmem>>, vector<4x3xf32>
    %cst_10 = arith.constant dense<0.000000e+00> : vector<4x4xf32>
    %20 = tpu.matmul %19, %18, %cst_10 {dimension_numbers = #tpu.dot_dimension_numbers<[1], [0], [0], [1], [0, 0, 1, 1], [], []>} : vector<4x3xf32>, vector<3x4xf32>, vector<4x4xf32> -> vector<4x4xf32>
    %21 = vector.extract_strided_slice %20 {offsets = [0, 0], sizes = [4, 2], strides = [1, 1]} : vector<4x4xf32> to vector<4x2xf32>
    %22 = vector.extract_strided_slice %20 {offsets = [0, 2], sizes = [4, 2], strides = [1, 1]} : vector<4x4xf32> to vector<4x2xf32>
    %23 = arith.addf %21, %22 : vector<4x2xf32>
    %24 = arith.negf %23 : vector<4x2xf32>
    %25 = math.exp %24 : vector<4x2xf32>
    %cst_11 = arith.constant 1.000000e+00 : f32
    %26 = vector.broadcast %cst_11 : f32 to vector<4x2xf32>
    %27 = arith.addf %26, %25 : vector<4x2xf32>
    %28 = arith.divf %26, %27 : vector<4x2xf32>
    %29 = vector.extract_strided_slice %28 {offsets = [0, 0], sizes = [4, 1], strides = [1, 1]} : vector<4x2xf32> to vector<4x1xf32>
    %30 = vector.extract_strided_slice %28 {offsets = [0, 1], sizes = [4, 1], strides = [1, 1]} : vector<4x2xf32> to vector<4x1xf32>
    %31 = tpu.concatenate %29, %30 in 0 : vector<4x1xf32>, vector<4x1xf32> -> vector<8x1xf32>
    %32 = vector.broadcast %31 : vector<8x1xf32> to vector<8x256xf32>
    %33 = arith.mulf %0, %32 : vector<8x256xf32>
    %34 = vector.extract_strided_slice %33 {offsets = [0, 0], sizes = [4, 256], strides = [1, 1]} : vector<8x256xf32> to vector<4x256xf32>
    %cst_12 = arith.constant dense<0.000000e+00> : vector<256xf32>
    %35 = vector.multi_reduction <add>, %34, %cst_12 [0] : vector<4x256xf32> to vector<256xf32>
    %36 = vector.shape_cast %35 : vector<256xf32> to vector<1x256xf32>
    %cst_13 = arith.constant 4.000000e+00 : f32
    %37 = vector.broadcast %cst_13 : f32 to vector<1x256xf32>
    %38 = arith.divf %36, %37 : vector<1x256xf32>
    %39 = vector.extract_strided_slice %33 {offsets = [4, 0], sizes = [4, 256], strides = [1, 1]} : vector<8x256xf32> to vector<4x256xf32>
    %cst_14 = arith.constant dense<0.000000e+00> : vector<256xf32>
    %40 = vector.multi_reduction <add>, %39, %cst_14 [0] : vector<4x256xf32> to vector<256xf32>
    %41 = vector.shape_cast %40 : vector<256xf32> to vector<1x256xf32>
    %cst_15 = arith.constant 4.000000e+00 : f32
    %42 = vector.broadcast %cst_15 : f32 to vector<1x256xf32>
    %43 = arith.divf %41, %42 : vector<1x256xf32>
    %44 = tpu.concatenate %38, %43 in 0 : vector<1x256xf32>, vector<1x256xf32> -> vector<2x256xf32>
    %45 = vector.extract_strided_slice %33 {offsets = [0, 0], sizes = [4, 256], strides = [1, 1]} : vector<8x256xf32> to vector<4x256xf32>
    %cst_16 = arith.constant dense<0xFF800000> : vector<256xf32>
    %46 = vector.multi_reduction <maximumf>, %45, %cst_16 [0] : vector<4x256xf32> to vector<256xf32>
    %47 = vector.shape_cast %46 : vector<256xf32> to vector<1x256xf32>
    %48 = vector.extract_strided_slice %33 {offsets = [4, 0], sizes = [4, 256], strides = [1, 1]} : vector<8x256xf32> to vector<4x256xf32>
    %cst_17 = arith.constant dense<0xFF800000> : vector<256xf32>
    %49 = vector.multi_reduction <maximumf>, %48, %cst_17 [0] : vector<4x256xf32> to vector<256xf32>
    %50 = vector.shape_cast %49 : vector<256xf32> to vector<1x256xf32>
    %51 = tpu.concatenate %47, %50 in 0 : vector<1x256xf32>, vector<1x256xf32> -> vector<2x256xf32>
    %c0_18 = arith.constant 0 : index
    %c0_19 = arith.constant 0 : index
    %52 = vector.load %arg4[%c0_18, %c0_19] : memref<9x256xf32, #tpu.memory_space<vmem>>, vector<9x256xf32>
    %cst_20 = arith.constant 0.000000e+00 : f32
    %53 = vector.broadcast %cst_20 : f32 to vector<2x256xf32>
    %c0_21 = arith.constant 0 : index
    %54 = memref.load %arg5[%c0_21] : memref<18xf32, #tpu.memory_space<smem>>
    %55 = vector.broadcast %54 : f32 to vector<2x256xf32>
    %56 = arith.mulf %55, %44 : vector<2x256xf32>
    %c9 = arith.constant 9 : index
    %57 = memref.load %arg5[%c9] : memref<18xf32, #tpu.memory_space<smem>>
    %58 = vector.broadcast %57 : f32 to vector<2x256xf32>
    %59 = arith.mulf %58, %51 : vector<2x256xf32>
    %60 = arith.addf %56, %59 : vector<2x256xf32>
    %c17_i32 = arith.constant 17 : i32
    %61 = tpu.dynamic_rotate %60 by %c17_i32 dim 1 : vector<2x256xf32>, i32 -> vector<2x256xf32>
    %62 = vector.extract_strided_slice %52 {offsets = [0, 0], sizes = [1, 256], strides = [1, 1]} : vector<9x256xf32> to vector<1x256xf32>
    %63 = vector.broadcast %62 : vector<1x256xf32> to vector<2x256xf32>
    %64 = arith.mulf %61, %63 : vector<2x256xf32>
    %65 = arith.addf %53, %64 : vector<2x256xf32>
    %c1 = arith.constant 1 : index
    %66 = memref.load %arg5[%c1] : memref<18xf32, #tpu.memory_space<smem>>
    %67 = vector.broadcast %66 : f32 to vector<2x256xf32>
    %68 = arith.mulf %67, %44 : vector<2x256xf32>
    %c10 = arith.constant 10 : index
    %69 = memref.load %arg5[%c10] : memref<18xf32, #tpu.memory_space<smem>>
    %70 = vector.broadcast %69 : f32 to vector<2x256xf32>
    %71 = arith.mulf %70, %51 : vector<2x256xf32>
    %72 = arith.addf %68, %71 : vector<2x256xf32>
    %c16_i32 = arith.constant 16 : i32
    %73 = tpu.dynamic_rotate %72 by %c16_i32 dim 1 : vector<2x256xf32>, i32 -> vector<2x256xf32>
    %74 = vector.extract_strided_slice %52 {offsets = [1, 0], sizes = [1, 256], strides = [1, 1]} : vector<9x256xf32> to vector<1x256xf32>
    %75 = vector.broadcast %74 : vector<1x256xf32> to vector<2x256xf32>
    %76 = arith.mulf %73, %75 : vector<2x256xf32>
    %77 = arith.addf %65, %76 : vector<2x256xf32>
    %c2 = arith.constant 2 : index
    %78 = memref.load %arg5[%c2] : memref<18xf32, #tpu.memory_space<smem>>
    %79 = vector.broadcast %78 : f32 to vector<2x256xf32>
    %80 = arith.mulf %79, %44 : vector<2x256xf32>
    %c11 = arith.constant 11 : index
    %81 = memref.load %arg5[%c11] : memref<18xf32, #tpu.memory_space<smem>>
    %82 = vector.broadcast %81 : f32 to vector<2x256xf32>
    %83 = arith.mulf %82, %51 : vector<2x256xf32>
    %84 = arith.addf %80, %83 : vector<2x256xf32>
    %c15_i32 = arith.constant 15 : i32
    %85 = tpu.dynamic_rotate %84 by %c15_i32 dim 1 : vector<2x256xf32>, i32 -> vector<2x256xf32>
    %86 = vector.extract_strided_slice %52 {offsets = [2, 0], sizes = [1, 256], strides = [1, 1]} : vector<9x256xf32> to vector<1x256xf32>
    %87 = vector.broadcast %86 : vector<1x256xf32> to vector<2x256xf32>
    %88 = arith.mulf %85, %87 : vector<2x256xf32>
    %89 = arith.addf %77, %88 : vector<2x256xf32>
    %c3 = arith.constant 3 : index
    %90 = memref.load %arg5[%c3] : memref<18xf32, #tpu.memory_space<smem>>
    %91 = vector.broadcast %90 : f32 to vector<2x256xf32>
    %92 = arith.mulf %91, %44 : vector<2x256xf32>
    %c12 = arith.constant 12 : index
    %93 = memref.load %arg5[%c12] : memref<18xf32, #tpu.memory_space<smem>>
    %94 = vector.broadcast %93 : f32 to vector<2x256xf32>
    %95 = arith.mulf %94, %51 : vector<2x256xf32>
    %96 = arith.addf %92, %95 : vector<2x256xf32>
    %c1_i32 = arith.constant 1 : i32
    %97 = tpu.dynamic_rotate %96 by %c1_i32 dim 1 : vector<2x256xf32>, i32 -> vector<2x256xf32>
    %98 = vector.extract_strided_slice %52 {offsets = [3, 0], sizes = [1, 256], strides = [1, 1]} : vector<9x256xf32> to vector<1x256xf32>
    %99 = vector.broadcast %98 : vector<1x256xf32> to vector<2x256xf32>
    %100 = arith.mulf %97, %99 : vector<2x256xf32>
    %101 = arith.addf %89, %100 : vector<2x256xf32>
    %c4 = arith.constant 4 : index
    %102 = memref.load %arg5[%c4] : memref<18xf32, #tpu.memory_space<smem>>
    %103 = vector.broadcast %102 : f32 to vector<2x256xf32>
    %104 = arith.mulf %103, %44 : vector<2x256xf32>
    %c13 = arith.constant 13 : index
    %105 = memref.load %arg5[%c13] : memref<18xf32, #tpu.memory_space<smem>>
    %106 = vector.broadcast %105 : f32 to vector<2x256xf32>
    %107 = arith.mulf %106, %51 : vector<2x256xf32>
    %108 = arith.addf %104, %107 : vector<2x256xf32>
    %109 = vector.extract_strided_slice %52 {offsets = [4, 0], sizes = [1, 256], strides = [1, 1]} : vector<9x256xf32> to vector<1x256xf32>
    %110 = vector.broadcast %109 : vector<1x256xf32> to vector<2x256xf32>
    %111 = arith.mulf %108, %110 : vector<2x256xf32>
    %112 = arith.addf %101, %111 : vector<2x256xf32>
    %c5 = arith.constant 5 : index
    %113 = memref.load %arg5[%c5] : memref<18xf32, #tpu.memory_space<smem>>
    %114 = vector.broadcast %113 : f32 to vector<2x256xf32>
    %115 = arith.mulf %114, %44 : vector<2x256xf32>
    %c14 = arith.constant 14 : index
    %116 = memref.load %arg5[%c14] : memref<18xf32, #tpu.memory_space<smem>>
    %117 = vector.broadcast %116 : f32 to vector<2x256xf32>
    %118 = arith.mulf %117, %51 : vector<2x256xf32>
    %119 = arith.addf %115, %118 : vector<2x256xf32>
    %c255_i32 = arith.constant 255 : i32
    %120 = tpu.dynamic_rotate %119 by %c255_i32 dim 1 : vector<2x256xf32>, i32 -> vector<2x256xf32>
    %121 = vector.extract_strided_slice %52 {offsets = [5, 0], sizes = [1, 256], strides = [1, 1]} : vector<9x256xf32> to vector<1x256xf32>
    %122 = vector.broadcast %121 : vector<1x256xf32> to vector<2x256xf32>
    %123 = arith.mulf %120, %122 : vector<2x256xf32>
    %124 = arith.addf %112, %123 : vector<2x256xf32>
    %c6 = arith.constant 6 : index
    %125 = memref.load %arg5[%c6] : memref<18xf32, #tpu.memory_space<smem>>
    %126 = vector.broadcast %125 : f32 to vector<2x256xf32>
    %127 = arith.mulf %126, %44 : vector<2x256xf32>
    %c15 = arith.constant 15 : index
    %128 = memref.load %arg5[%c15] : memref<18xf32, #tpu.memory_space<smem>>
    %129 = vector.broadcast %128 : f32 to vector<2x256xf32>
    %130 = arith.mulf %129, %51 : vector<2x256xf32>
    %131 = arith.addf %127, %130 : vector<2x256xf32>
    %c241_i32 = arith.constant 241 : i32
    %132 = tpu.dynamic_rotate %131 by %c241_i32 dim 1 : vector<2x256xf32>, i32 -> vector<2x256xf32>
    %133 = vector.extract_strided_slice %52 {offsets = [6, 0], sizes = [1, 256], strides = [1, 1]} : vector<9x256xf32> to vector<1x256xf32>
    %134 = vector.broadcast %133 : vector<1x256xf32> to vector<2x256xf32>
    %135 = arith.mulf %132, %134 : vector<2x256xf32>
    %136 = arith.addf %124, %135 : vector<2x256xf32>
    %c7 = arith.constant 7 : index
    %137 = memref.load %arg5[%c7] : memref<18xf32, #tpu.memory_space<smem>>
    %138 = vector.broadcast %137 : f32 to vector<2x256xf32>
    %139 = arith.mulf %138, %44 : vector<2x256xf32>
    %c16 = arith.constant 16 : index
    %140 = memref.load %arg5[%c16] : memref<18xf32, #tpu.memory_space<smem>>
    %141 = vector.broadcast %140 : f32 to vector<2x256xf32>
    %142 = arith.mulf %141, %51 : vector<2x256xf32>
    %143 = arith.addf %139, %142 : vector<2x256xf32>
    %c240_i32 = arith.constant 240 : i32
    %144 = tpu.dynamic_rotate %143 by %c240_i32 dim 1 : vector<2x256xf32>, i32 -> vector<2x256xf32>
    %145 = vector.extract_strided_slice %52 {offsets = [7, 0], sizes = [1, 256], strides = [1, 1]} : vector<9x256xf32> to vector<1x256xf32>
    %146 = vector.broadcast %145 : vector<1x256xf32> to vector<2x256xf32>
    %147 = arith.mulf %144, %146 : vector<2x256xf32>
    %148 = arith.addf %136, %147 : vector<2x256xf32>
    %c8 = arith.constant 8 : index
    %149 = memref.load %arg5[%c8] : memref<18xf32, #tpu.memory_space<smem>>
    %150 = vector.broadcast %149 : f32 to vector<2x256xf32>
    %151 = arith.mulf %150, %44 : vector<2x256xf32>
    %c17 = arith.constant 17 : index
    %152 = memref.load %arg5[%c17] : memref<18xf32, #tpu.memory_space<smem>>
    %153 = vector.broadcast %152 : f32 to vector<2x256xf32>
    %154 = arith.mulf %153, %51 : vector<2x256xf32>
    %155 = arith.addf %151, %154 : vector<2x256xf32>
    %c239_i32 = arith.constant 239 : i32
    %156 = tpu.dynamic_rotate %155 by %c239_i32 dim 1 : vector<2x256xf32>, i32 -> vector<2x256xf32>
    %157 = vector.extract_strided_slice %52 {offsets = [8, 0], sizes = [1, 256], strides = [1, 1]} : vector<9x256xf32> to vector<1x256xf32>
    %158 = vector.broadcast %157 : vector<1x256xf32> to vector<2x256xf32>
    %159 = arith.mulf %156, %158 : vector<2x256xf32>
    %160 = arith.addf %148, %159 : vector<2x256xf32>
    %c0_22 = arith.constant 0 : index
    %161 = memref.load %arg6[%c0_22] : memref<1xf32, #tpu.memory_space<smem>>
    %162 = vector.broadcast %161 : f32 to vector<2x256xf32>
    %163 = arith.addf %160, %162 : vector<2x256xf32>
    %164 = arith.negf %163 : vector<2x256xf32>
    %165 = math.exp %164 : vector<2x256xf32>
    %cst_23 = arith.constant 1.000000e+00 : f32
    %166 = vector.broadcast %cst_23 : f32 to vector<2x256xf32>
    %167 = arith.addf %166, %165 : vector<2x256xf32>
    %168 = arith.divf %166, %167 : vector<2x256xf32>
    %169 = vector.extract_strided_slice %33 {offsets = [0, 0], sizes = [4, 256], strides = [1, 1]} : vector<8x256xf32> to vector<4x256xf32>
    %170 = vector.extract_strided_slice %168 {offsets = [0, 0], sizes = [1, 256], strides = [1, 1]} : vector<2x256xf32> to vector<1x256xf32>
    %171 = vector.broadcast %170 : vector<1x256xf32> to vector<4x256xf32>
    %172 = arith.mulf %169, %171 : vector<4x256xf32>
    %173 = vector.extract_strided_slice %33 {offsets = [4, 0], sizes = [4, 256], strides = [1, 1]} : vector<8x256xf32> to vector<4x256xf32>
    %174 = vector.extract_strided_slice %168 {offsets = [1, 0], sizes = [1, 256], strides = [1, 1]} : vector<2x256xf32> to vector<1x256xf32>
    %175 = vector.broadcast %174 : vector<1x256xf32> to vector<4x256xf32>
    %176 = arith.mulf %173, %175 : vector<4x256xf32>
    %177 = tpu.concatenate %172, %176 in 0 : vector<4x256xf32>, vector<4x256xf32> -> vector<8x256xf32>
    %c0_24 = arith.constant 0 : index
    %c0_25 = arith.constant 0 : index
    %178 = vector.load %arg7[%c0_24, %c0_25] : memref<8x256xf32, #tpu.memory_space<vmem>>, vector<8x256xf32>
    tpu.vector_store %arg7[%c0_24, %c0_25], %177 {strides = array<i32>} : memref<8x256xf32, #tpu.memory_space<vmem>>, vector<8x256xf32>,
    return
  }
  func.func @transform_0(%arg0: i32) -> (i32, i32) {
    %c0_i32 = arith.constant 0 : i32
    %c0_i32_0 = arith.constant 0 : i32
    return %arg0, %c0_i32 : i32, i32
  }
  func.func @transform_1(%arg0: i32) -> (i32, i32) {
    %c0_i32 = arith.constant 0 : i32
    %c0_i32_0 = arith.constant 0 : i32
    %c0_i32_1 = arith.constant 0 : i32
    return %c0_i32, %c0_i32_0 : i32, i32
  }
  func.func @transform_2(%arg0: i32) -> (i32, i32) {
    %c0_i32 = arith.constant 0 : i32
    %c0_i32_0 = arith.constant 0 : i32
    %c0_i32_1 = arith.constant 0 : i32
    return %c0_i32, %c0_i32_0 : i32, i32
  }
  func.func @transform_3(%arg0: i32) -> (i32, i32) {
    %c0_i32 = arith.constant 0 : i32
    %c0_i32_0 = arith.constant 0 : i32
    %c0_i32_1 = arith.constant 0 : i32
    return %c0_i32, %c0_i32_0 : i32, i32
  }
  func.func @transform_4(%arg0: i32) -> i32 {
    %c0_i32 = arith.constant 0 : i32
    %c0_i32_0 = arith.constant 0 : i32
    return %c0_i32 : i32
  }
  func.func @transform_5(%arg0: i32) -> i32 {
    %c0_i32 = arith.constant 0 : i32
    %c0_i32_0 = arith.constant 0 : i32
    return %c0_i32 : i32
  }
  func.func @transform_6(%arg0: i32) -> (i32, i32) {
    %c0_i32 = arith.constant 0 : i32
    %c0_i32_0 = arith.constant 0 : i32
    return %arg0, %c0_i32 : i32, i32
  }
}

</mosaic_0001>

<bundles_post_ra>
// kernel: tpu_custom_call.1
= control target key start
LH: loop header
LB: loop body
LE: loop exit
PB: predicated region body
PF: predicated region fallthrough
CT: control target
= control target key end

     0   :  { %12 = vsyncpa [#allocation4], 0  ;;  %s1139_s0 = inlined_call_operand.hbm [shape: f32[8,256], index: 0, kind: input, shape index: {}]   ;;  %s1140_s1 = inlined_call_operand.hbm [shape: f32[2,5], index: 1, kind: input, shape index: {}]   ;;  %s1141_s2 = inlined_call_operand.vmem [shape: f32[4,3], index: 2, kind: input, shape index: {}]   ;;  %s1142_s3 = inlined_call_operand.hbm [shape: f32[9,256], index: 3, kind: input, shape index: {}]   ;;  %s1143_s4 = inlined_call_operand.vmem [shape: f32[18], index: 4, kind: input, shape index: {}]   ;;  %s1144_s5 = inlined_call_operand.<no memory space> [shape: f32[1], index: 5, kind: input, shape index: {}]   ;;  %s1145_s6 = inlined_call_operand.hbm [shape: f32[8,256], index: 6, kind: output, shape index: {}]  }
   0x1   :  { %13 = vsyncpa [#allocation8], 0 }
   0x2   :  { %14 = vsyncpa [#allocation6], 0 }
   0x3   :  { %15 = vsyncpa [#allocation5], 0  ;;  %s844_s21 = smov [#allocation7]   ;;  %s845_s23 = smov [#allocation3]  }
   0x4   :  { %s32_s22 = sshll.u32 %s844_s21, 4  ;;  %s22_s24 = sshll.u32 %s845_s23, 4  ;;  %s33_s22 = int_to_ptr.vmem [resolvable:$true] %s32_s22  ;;  %s23_s24 = int_to_ptr.vmem [resolvable:$true] %s22_s24 }
   0x5   :  { %s752_s25 = scalar_lea.vmem %s33_s22, 32  ;;  %p757_p1 = scmp.lt.s32.totalorder %s33_s22, %s33_s22 }
   0x6   :  { %p753_p0 = scmp.ne.s32.totalorder %s33_s22, %s752_s25  ;;  %p758_p2 = scmp.lt.s32.totalorder %s752_s25, %s752_s25 }
   0x8   :  { %p759_p3 = por %p758_p2, %p757_p1 }
   0xa   :  { %p760_p4 = pnand %p759_p3, %p753_p0 }
   0xc   :  { %763 = shalt.err (!%p760_p4)
}
   0xd   :  { %35 = dma.hbm_to_vmem [thread:$0]  %s1140_s1, 32, %s33_s22, [#allocation8]  }
   0xe   :  { %s772_s28 = scalar_lea.vmem %s23_s24, 256  ;;  %p777_p6 = scmp.lt.s32.totalorder %s23_s24, %s23_s24 }
   0xf   :  { %p773_p5 = scmp.ne.s32.totalorder %s23_s24, %s772_s28  ;;  %p778_p7 = scmp.lt.s32.totalorder %s772_s28, %s772_s28 }
  0x11   :  { %p779_p8 = por %p778_p7, %p777_p6 }
  0x13   :  { %p780_p9 = pnand %p779_p8, %p773_p5 }
  0x15   :  { %783 = shalt.err (!%p780_p9)
}
  0x16   :  { %25 = dma.hbm_to_vmem [thread:$0]  %s1139_s0, 256, %s23_s24, [#allocation4]  }
  0x17   :  { %s846_s7 = smov [#allocation9]   ;;  %s56_s11 = sshll.u32 %s1143_s4, 4  ;;  %s57_s11 = int_to_ptr.vmem [resolvable:$true] %s56_s11 }
  0x18   :  { %s43_s8 = sshll.u32 %s846_s7, 4  ;;  %s44_s8 = int_to_ptr.vmem [resolvable:$true] %s43_s8 }
  0x19   :  { %s792_s12 = scalar_lea.vmem %s44_s8, 512  ;;  %p797_p11 = scmp.lt.s32.totalorder %s44_s8, %s44_s8 }
  0x1a   :  { %p793_p10 = scmp.ne.s32.totalorder %s44_s8, %s792_s12  ;;  %p798_p12 = scmp.lt.s32.totalorder %s792_s12, %s792_s12 }
  0x1c   :  { %p799_p13 = por %p798_p12, %p797_p11 }
  0x1e   :  { %p800_p0 = pnand %p799_p13, %p793_p10 }
  0x20   :  { %803 = shalt.err (!%p800_p0)
}
  0x21   :  { %s847_s1 = smov 256   ;;  %s848_s13 = smov 16  }
  0x22   :  { %49 = dma.hbm_to_vmem [thread:$0]  %s1142_s3, 512, %s44_s8, [#allocation8], %s847_s1, %s847_s1, %s848_s13  }
  0x23   :  { %s804_s0 = scalar_lea.vmem %s57_s11, 16  ;;  %p809_p2 = scmp.lt.s32.totalorder %s57_s11, %s57_s11 }
  0x24   :  { %p805_p1 = scmp.ne.s32.totalorder %s57_s11, %s804_s0  ;;  %p810_p3 = scmp.lt.s32.totalorder %s804_s0, %s804_s0 }
  0x26   :  { %p811_p4 = por %p810_p3, %p809_p2 }
  0x28   :  { %p812_p5 = pnand %p811_p4, %p805_p1 }
  0x2a   :  { %815 = shalt.err (!%p812_p5)
}
  0x2b   :  { %s849_s4 = smov [#allocation10]  }
  0x2c   :  { %59 = dma.vmem_to_smem %s57_s11, 16, %s849_s4, [#allocation6]  }
  0x2d   :  { %836 = dma.done.wait [#allocation4], 256  }
  0x2e   :  { %837 = vsyncadd [#allocation4], 4294967040 }
  0x2f   :  { %838 = dma.done.wait [#allocation8], 544  }
  0x30   :  { %839 = vsyncadd [#allocation8], 4294966752 }
  0x31   :  { %840 = dma.done.wait [#allocation6], 16  }
  0x32   :  { %841 = vsyncadd [#allocation6], 4294967280 }
  0x33   :  { %74 = sfence }
  0x34   :  { %v75_v0 = vld [vmem:[#allocation3] sm:$0xff]  ;;  %v76_v1 = vld [vmem:[#allocation3 + $0x8] sm:$0xff]  ;;  %v850_v4 = vmov 0.0   ;;  %vm851_vm0 = vmmov 0   ;;  %vm91_vm1 = vcmask 7168   ;;  %vm93_vm2 = vcmask 15360  }
  0x35   :  { %v77_v2 = vadd.f32 %v76_v1, %v75_v0  ;;  %v82_v3 = vmax.f32 %v75_v0, %v76_v1  ;;  %703 = vmatprep.subr.mxu0 %v850_v4  ;;  %708 = vmatprep.subr.mxu1 %v850_v4  ;;  %vm95_vm3 = vcmask 23552   ;;  %vm97_vm4 = vcmask 1043456   ;;  %v99_v13 = vld [vmem:[#allocation7] sm:$0x3]  ;;  %v181_v18 = vld [vmem:[%s1141_s2] sm:$0xf] }
  0x36   :  { %705 = vmatprep.mubr.msk.f32.mxu0 %vm851_vm0, %v850_v4  ;;  %710 = vmatprep.mubr.msk.f32.mxu1 %vm851_vm0, %v850_v4  ;;  %vm104_vm5 = vcmask 1044480   ;;  %vm100_vm6 = vcmask 39936   ;;  %vm179_vm7 = vcmask 1041408   ;;  %vm185_vm8 = vcmask 1042432   ;;  %s852_s17 = smov 126   ;;  %s854_s2 = smov 127  }
  0x37   :  { %78 = vadd.xlane.f32.xlu0 %v77_v2  ;;  %v853_v27 = vmov 0   ;;  %vm339_vm9 = vcmask 1047556   ;;  %s938_s18 = sld [smem:[#allocation10 + $0x6]]  ;;  %vm322_vm10 = vcmask 1040384   ;;  %s855_s7 = smov 113  }
  0x38   :  { %731 = vset.pattern.permute.xlu0 %v853_v27  ;;  %s940_s19 = sld [smem:[#allocation10]]  ;;  %s856_s8 = smov 17  }
  0x39   :  { %s942_s20 = sld [smem:[#allocation10 + $0xf]]  ;;  %s857_s10 = smov 112  }
  0x3a   :  { %s944_s21 = sld [smem:[#allocation10 + $0x9]]  ;;  %s858_s12 = smov 111  }
  0x3b   :  { %83 = vmax.xlane.f32.xlu0 %v82_v3  ;;  %s946_s22 = sld [smem:[#allocation10 + $0x7]]  ;;  %s859_s15 = smov 15  }
  0x3c   :  { %s948_s23 = sld [smem:[#allocation10 + $0x10]] }
  0x3d   :  { %s952_s24 = sld [smem:[#allocation10 + $0x8]] }
  0x3e   :  { %s954_s25 = sld [smem:[#allocation10 + $0x1]] }
  0x3f   :  { %s956_s26 = sld [smem:[#allocation10 + $0x11]] }
  0x40   :  { %s960_s27 = sld [smem:[#allocation10 + $0xa]] }
  0x41   :  { %s984_s28 = sld [smem:[#allocation10 + $0x4]] }
  0x42   :  { %s990_s29 = sld [smem:[#allocation10 + $0xd]] }
  0x43   :  { %s994_s30 = sld [smem:[#allocation10 + $0x2]] }
  0x44   :  { %s1003_s9 = sld [smem:[#allocation10 + $0xb]] }
  0x45   :  { %s1018_s11 = sld [smem:[#allocation10 + $0x3]] }
  0x46   :  { %s684_s1 = sld [smem:[#allocation10 + $0xc]] }
  0x47   :  { %s687_s14 = sld [smem:[#allocation10 + $0x5]] }
  0x48   :  { %s688_s0 = sld [smem:[#allocation10 + $0xe]] }
  0xc0   :  { %v79_v5 = vpop.xlane.xlu0 %78 }
  0xc1   :  { %v81_v6 = vmul.f32 0.00390625, %v79_v5 }
  0xc3   :  { %v86_v7 = vrot.slane %v81_v6, 4 }
  0xc4   :  { %v84_v8 = vpop.xlane.xlu0 %83 }
  0xc5   :  { %v92_v9 = vsel %vm91_vm1, %v81_v6, %v86_v7  ;;  %v89_v10 = vrot.slane %v84_v8, 4 }
  0xc6   :  { %v94_v11 = vsel %vm93_vm2, %v92_v9, %v84_v8 }
  0xc7   :  { %v96_v12 = vsel %vm95_vm3, %v94_v11, %v89_v10 }
  0xc8   :  { %v98_v14 = vsel %vm97_vm4, %v96_v12, 1.0 }
  0xc9   :  { %704 = vmatpush3.msk.msra.mxu0 %vm104_vm5, %v98_v14 }
  0xca   :  { %706 = vmatmul.mubr.msk.f32.vlgmr.msra.gmra.mxu0 %vm100_vm6, %v99_v13 }
 0x18a   :  { %v174_v15 = vpop.f32.mrf.mxu0 }
 0x18b   :  { %v178_v16 = vmax.f32 %v174_v15, 0.0 }
 0x18c   :  { %v707_v17 = vpop.f32.mrf.mxu0 }
 0x18d   :  { %v180_v19 = vsel %vm179_vm7, %v178_v16, 1.0 }
 0x18e   :  { %709 = vmatpush3.msk.msra.mxu1 %vm185_vm8, %v180_v19 }
 0x18f   :  { %711 = vmatmul.mubr.msk.f32.vlgmr.msra.gmra.mxu1 %vm95_vm3, %v181_v18 }
 0x24f   :  { %v255_v20 = vpop.f32.mrf.mxu1 }
 0x250   :  { %260 = vrot.lane.b32.xlu1 %v255_v20, %s852_s17 }
 0x251   :  { %v712_v21 = vpop.f32.mrf.mxu1 }
 0x2c2   :  { %v261_v22 = vpop.permute.xlu1 %260 }
 0x2c3   :  { %v263_v23 = vadd.f32 %v261_v22, %v255_v20 }
 0x2c5   :  { %v677_v24 = vmul.f32 -1.442695, %v263_v23  ;;  %v530_v23 = vstv %s938_s18 }
 0x2c7   :  { %732 = vpow2.f32 %v677_v24  ;;  %v361_v24 = vstv %s940_s19 }
 0x2d4   :  { %v733_v25 = vpop.eup %732 }
 0x2d5   :  { %v267_v26 = vadd.f32 1.0, %v733_v25 }
 0x2d7   :  { %734 = vrcp.f32 %v267_v26 }
 0x2e4   :  { %v735_v28 = vpop.eup %734 }
 0x2e5   :  { %v271_v29 = vrot.slane %v735_v28, 4 }
 0x2e7   :  { %272 = vrot.lane.b32.xlu1 %v271_v29, %s854_s2 }
 0x359   :  { %v273_v30 = vpop.permute.xlu1 %272 }
 0x35a   :  { %v275_v31 = vsel %vm97_vm4, %v735_v28, %v273_v30 }
 0x35b   :  { %278 = vperm.xlu0 %731, %v275_v31  }
 0x3d6   :  { %v279_v32 = vpop.permute.xlu0 %278 }
 0x3d7   :  { %v918_v33 = vmul.f32 %v279_v32, %v75_v0  ;;  %v920_v34 = vmul.f32 %v279_v32, %v76_v1 }
 0x3d9   :  { %v283_v35 = vsel %vm97_vm4, %v918_v33, 0.0  ;;  %v290_v36 = vsel %vm97_vm4, %v920_v34, 0.0  ;;  %v302_v37 = vrot.slane %v918_v33, 4  ;;  %v303_v38 = vrot.slane %v920_v34, 4 }
 0x3da   :  { %v284_v39 = vrot.slane %v283_v35, 4  ;;  %v291_v40 = vrot.slane %v290_v36, 4  ;;  %v325_v41 = vsel %vm97_vm4, %v918_v33, -inf  ;;  %v332_v42 = vsel %vm97_vm4, %v920_v34, -inf }
 0x3db   :  { %v306_v43 = vsel %vm97_vm4, %v302_v37, 0.0  ;;  %v313_v44 = vsel %vm97_vm4, %v303_v38, 0.0  ;;  %v326_v45 = vrot.slane %v325_v41, 4  ;;  %v333_v46 = vrot.slane %v332_v42, 4 }
 0x3dc   :  { %v285_v47 = vadd.f32 %v284_v39, %v283_v35  ;;  %v292_v48 = vadd.f32 %v291_v40, %v290_v36  ;;  %v307_v49 = vrot.slane %v306_v43, 4  ;;  %v314_v50 = vrot.slane %v313_v44, 4 }
 0x3dd   :  { %v327_v51 = vmax.f32 %v325_v41, %v326_v45  ;;  %v334_v52 = vmax.f32 %v332_v42, %v333_v46  ;;  %v340_v53 = vsel %vm339_vm9, %v918_v33, -inf  ;;  %v347_v54 = vsel %vm339_vm9, %v920_v34, -inf }
 0x3de   :  { %v286_v55 = vrot.slane %v285_v47, 2  ;;  %v293_v56 = vrot.slane %v292_v48, 2  ;;  %v308_v57 = vadd.f32 %v307_v49, %v306_v43  ;;  %v315_v58 = vadd.f32 %v314_v50, %v313_v44 }
 0x3df   :  { %v328_v59 = vrot.slane %v327_v51, 2  ;;  %v335_v60 = vrot.slane %v334_v52, 2  ;;  %v341_v61 = vrot.slane %v340_v53, 4  ;;  %v348_v62 = vrot.slane %v347_v54, 4 }
 0x3e0   :  { %v287_v63 = vadd.f32 %v286_v55, %v285_v47  ;;  %v294_v0 = vadd.f32 %v293_v56, %v292_v48  ;;  %v309_v1 = vrot.slane %v308_v57, 2  ;;  %v316_v2 = vrot.slane %v315_v58, 2 }
 0x3e1   :  { %v329_v3 = vmax.f32 %v327_v51, %v328_v59  ;;  %v336_v4 = vmax.f32 %v334_v52, %v335_v60  ;;  %v342_v5 = vmax.f32 %v340_v53, %v341_v61  ;;  %v349_v6 = vmax.f32 %v347_v54, %v348_v62 }
 0x3e2   :  { %v288_v7 = vrot.slane %v287_v63, 1  ;;  %v295_v8 = vrot.slane %v294_v0, 1  ;;  %v310_v9 = vadd.f32 %v309_v1, %v308_v57  ;;  %v317_v10 = vadd.f32 %v316_v2, %v315_v58 }
 0x3e3   :  { %v330_v11 = vrot.slane %v329_v3, 1  ;;  %v337_v12 = vrot.slane %v336_v4, 1  ;;  %v343_v13 = vrot.slane %v342_v5, 2  ;;  %v350_v14 = vrot.slane %v349_v6, 2 }
 0x3e4   :  { %v289_v15 = vadd.f32 %v288_v7, %v287_v63  ;;  %v296_v16 = vadd.f32 %v295_v8, %v294_v0  ;;  %v311_v17 = vrot.slane %v310_v9, 1  ;;  %v318_v18 = vrot.slane %v317_v10, 1 }
 0x3e5   :  { %v344_v19 = vmax.f32 %v342_v5, %v343_v13  ;;  %v351_v20 = vmax.f32 %v349_v6, %v350_v14  ;;  %v331_v25 = vmax.f32 %v329_v3, %v330_v11  ;;  %v338_v26 = vmax.f32 %v336_v4, %v337_v12 }
 0x3e6   :  { %v312_v21 = vadd.f32 %v311_v17, %v310_v9  ;;  %v319_v22 = vadd.f32 %v318_v18, %v317_v10  ;;  %v298_v29 = vmul.f32 0.25, %v289_v15  ;;  %v299_v30 = vmul.f32 0.25, %v296_v16 }
 0x3e7   :  { %v345_v27 = vrot.slane %v344_v19, 1  ;;  %v352_v28 = vrot.slane %v351_v20, 1  ;;  %v534_v37 = vstv %s942_s20  ;;  %v365_v38 = vstv %s944_s21 }
 0x3e8   :  { %v320_v31 = vmul.f32 0.25, %v312_v21  ;;  %v321_v32 = vmul.f32 0.25, %v319_v22  ;;  %v559_v41 = vstv %s946_s22  ;;  %v563_v48 = vstv %s948_s23 }
 0x3e9   :  { %v346_v35 = vmax.f32 %v344_v19, %v345_v27  ;;  %v353_v36 = vmax.f32 %v351_v20, %v352_v28  ;;  %v588_v53 = vstv %s952_s24  ;;  %v392_v54 = vstv %s954_s25 }
 0x3ea   :  { %v963_v39 = vsel %vm322_vm10, %v299_v30, %v321_v32  ;;  %v966_v40 = vsel %vm322_vm10, %v298_v29, %v320_v31  ;;  %v592_v57 = vstv %s956_s26  ;;  %v396_v58 = vstv %s960_s27 }
 0x3eb   :  { %v970_v42 = vsel %vm322_vm10, %v338_v26, %v353_v36  ;;  %v532_v43 = vmul.f32 %v530_v23, %v963_v39  ;;  %v976_v44 = vsel %vm322_vm10, %v331_v25, %v346_v35  ;;  %v362_v45 = vmul.f32 %v361_v24, %v966_v40 }
 0x3ec   :  { %v536_v46 = vmul.f32 %v534_v37, %v970_v42  ;;  %v366_v47 = vmul.f32 %v365_v38, %v976_v44  ;;  %v561_v51 = vmul.f32 %v559_v41, %v963_v39  ;;  %v363_v52 = vmul.f32 %v361_v24, %v963_v39 }
 0x3ed   :  { %v565_v55 = vmul.f32 %v563_v48, %v970_v42  ;;  %v367_v56 = vmul.f32 %v365_v38, %v970_v42  ;;  %v590_v61 = vmul.f32 %v588_v53, %v963_v39  ;;  %v393_v62 = vmul.f32 %v392_v54, %v966_v40 }
 0x3ee   :  { %v538_v49 = vadd.f32 %v536_v46, %v532_v43  ;;  %v368_v50 = vadd.f32 %v366_v47, %v362_v45  ;;  %v594_v63 = vmul.f32 %v592_v57, %v970_v42  ;;  %v397_v0 = vmul.f32 %v396_v58, %v976_v44 }
 0x3ef   :  { %v567_v59 = vadd.f32 %v565_v55, %v561_v51  ;;  %v369_v60 = vadd.f32 %v367_v56, %v363_v52  ;;  %v479_v1 = vstv %s984_s28  ;;  %v394_v4 = vmul.f32 %v392_v54, %v963_v39 }
 0x3f0   :  { %541 = vrot.lane.b32.xlu0 %v538_v49, %s855_s7  ;;  %370 = vrot.lane.b32.xlu1 %v368_v50, %s856_s8  ;;  %v596_v2 = vadd.f32 %v594_v63, %v590_v61  ;;  %v399_v3 = vadd.f32 %v397_v0, %v393_v62  ;;  %v483_v5 = vstv %s990_s29  ;;  %v421_v6 = vstv %s994_s30  ;;  %v1081_v62 = vld [vmem:[#allocation9] sm:$0xff]  ;;  %v1083_v63 = vld [vmem:[#allocation9 + $0x8] sm:$0xff] }
 0x3f1   :  { %v398_v7 = vmul.f32 %v396_v58, %v970_v42  ;;  %v480_v8 = vmul.f32 %v479_v1, %v966_v40  ;;  %v481_v9 = vmul.f32 %v479_v1, %v963_v39  ;;  %v425_v10 = vstv %s1003_s9 }
 0x3f2   :  { %v484_v11 = vmul.f32 %v483_v5, %v976_v44  ;;  %v485_v12 = vmul.f32 %v483_v5, %v970_v42  ;;  %v422_v14 = vmul.f32 %v421_v6, %v966_v40  ;;  %v426_v17 = vmul.f32 %v425_v10, %v976_v44 }
 0x3f3   :  { %v400_v13 = vadd.f32 %v398_v7, %v394_v4  ;;  %v423_v19 = vmul.f32 %v421_v6, %v963_v39  ;;  %v450_v20 = vstv %s1018_s11  ;;  %v427_v21 = vmul.f32 %v425_v10, %v970_v42 }
 0x3f4   :  { %570 = vrot.lane.b32.xlu0 %v567_v59, %s857_s10  ;;  %372 = vrot.lane.b32.xlu1 %v369_v60, %s856_s8  ;;  %v1029_v15 = vadd.f32 %v484_v11, %v480_v8  ;;  %v1031_v16 = vadd.f32 %v485_v12, %v481_v9  ;;  %v428_v18 = vadd.f32 %v426_v17, %v422_v14  ;;  %v454_v22 = vstv %s684_s1 }
 0x3f5   :  { %v429_v24 = vadd.f32 %v427_v21, %v423_v19  ;;  %v451_v25 = vmul.f32 %v450_v20, %v966_v40  ;;  %v455_v26 = vmul.f32 %v454_v22, %v976_v44  ;;  %v452_v28 = vmul.f32 %v450_v20, %v963_v39 }
 0x3f6   :  { %v501_v29 = vstv %s687_s14  ;;  %v456_v30 = vmul.f32 %v454_v22, %v970_v42  ;;  %v505_v31 = vstv %s688_s0  ;;  %v531_v47 = vmul.f32 %v530_v23, %v966_v40 }
 0x3f7   :  { %v457_v27 = vadd.f32 %v455_v26, %v451_v25  ;;  %v502_v35 = vmul.f32 %v501_v29, %v966_v40  ;;  %v506_v36 = vmul.f32 %v505_v31, %v976_v44  ;;  %v503_v43 = vmul.f32 %v501_v29, %v963_v39 }
 0x3f8   :  { %599 = vrot.lane.b32.xlu0 %v596_v2, %s858_s12  ;;  %401 = vrot.lane.b32.xlu1 %v399_v3, %s848_s13  ;;  %v458_v32 = vadd.f32 %v456_v30, %v452_v28  ;;  %v507_v45 = vmul.f32 %v505_v31, %v970_v42  ;;  %v535_v49 = vmul.f32 %v534_v37, %v976_v44  ;;  %v374_v59 = vlaneseq }
 0x3f9   :  { %v508_v38 = vadd.f32 %v506_v36, %v502_v35  ;;  %v560_v51 = vmul.f32 %v559_v41, %v966_v40  ;;  %v564_v39 = vmul.f32 %v563_v48, %v976_v44  ;;  %v589_v42 = vmul.f32 %v588_v53, %v966_v40 }
 0x3fa   :  { %v509_v46 = vadd.f32 %v507_v45, %v503_v43  ;;  %v537_v50 = vadd.f32 %v535_v49, %v531_v47  ;;  %v593_v23 = vmul.f32 %v592_v57, %v976_v44  ;;  %v1069_v48 = vshrl.u32 %v374_v59, 7 }
 0x3fb   :  { %v566_v52 = vadd.f32 %v564_v39, %v560_v51  ;;  %v1071_v61 = vand.u32 127, %v374_v59 }
 0x3fc   :  { %403 = vrot.lane.b32.xlu1 %v400_v13, %s848_s13  ;;  %s860_s13 = smov 1   ;;  %v595_v54 = vadd.f32 %v593_v23, %v589_v42  ;;  %v1074_v40 = vsub.s32 1, %v1069_v48  ;;  %v1077_v44 = vsub.s32 0, %v1069_v48  ;;  %v439_v57 = vsub.s32 2, %v1069_v48 }
 0x3fd   :  { %vm405_vm11 = vcmp.lt.s32.totalorder %v1071_v61, 16  ;;  %vm376_vm12 = vcmp.lt.s32.totalorder %v1071_v61, 17  ;;  %vm434_vm13 = vcmp.lt.s32.totalorder %v1071_v61, 15  ;;  %v468_v2 = vsub.s32 3, %v1069_v48 }
 0x3fe   :  { %v411_v0 = vrot.slane %v1081_v62, %v1074_v40  ;;  %v415_v1 = vrot.slane %v1083_v63, %v1074_v40  ;;  %v382_v4 = vrot.slane %v1081_v62, %v1077_v44  ;;  %v490_v7 = vsub.s32 4, %v1069_v48 }
 0x3ff   :  { %v386_v8 = vrot.slane %v1083_v63, %v1077_v44  ;;  %v440_v9 = vrot.slane %v1081_v62, %v439_v57  ;;  %v444_v10 = vrot.slane %v1083_v63, %v439_v57  ;;  %vm463_vm14 = vcmp.lt.s32.totalorder %v1071_v61, 1 }
 0x400   :  { %430 = vrot.lane.b32.xlu1 %v428_v18, %s859_s15  ;;  %v469_v19 = vrot.slane %v1081_v62, %v468_v2  ;;  %v473_v20 = vrot.slane %v1083_v63, %v468_v2  ;;  %v519_v25 = vsub.s32 5, %v1069_v48  ;;  %v491_v30 = vrot.slane %v1081_v62, %v490_v7 }
 0x401   :  { %vm514_vm15 = vcmp.lt.s32.totalorder %v1071_v61, 127  ;;  %v548_v31 = vsub.s32 6, %v1069_v48  ;;  %vm543_vm0 = vcmp.lt.s32.totalorder %v1071_v61, 113  ;;  %v577_v39 = vsub.s32 7, %v1069_v48 }
 0x402   :  { %v520_v47 = vrot.slane %v1081_v62, %v519_v25  ;;  %v524_v49 = vrot.slane %v1083_v63, %v519_v25  ;;  %vm572_vm1 = vcmp.lt.s32.totalorder %v1071_v61, 112  ;;  %vm601_vm2 = vcmp.lt.s32.totalorder %v1071_v61, 111 }
 0x403   :  { %v578_v57 = vrot.slane %v1081_v62, %v577_v39  ;;  %v617_v61 = vstv %s1144_s5  ;;  %s861_s5 = smov [#allocation11]  }
 0x404   :  { %432 = vrot.lane.b32.xlu1 %v429_v24, %s859_s15  ;;  %s662_s16 = sshll.u32 %s861_s5, 4  ;;  %s663_s16 = int_to_ptr.vmem [resolvable:$true] %s662_s16 }
 0x405   :  { %s816_s17 = scalar_lea.vmem %s663_s16, 256  ;;  %p821_p7 = scmp.lt.s32.totalorder %s663_s16, %s663_s16 }
 0x406   :  { %p817_p6 = scmp.ne.s32.totalorder %s663_s16, %s816_s17  ;;  %p822_p8 = scmp.lt.s32.totalorder %s816_s17, %s816_s17 }
 0x408   :  { %459 = vrot.lane.b32.xlu1 %v457_v27, %s860_s13  ;;  %p823_p9 = por %p822_p8, %p821_p7 }
 0x40a   :  { %p824_p10 = pnand %p823_p9, %p817_p6 }
 0x40c   :  { %461 = vrot.lane.b32.xlu1 %v458_v32, %s860_s13 }
 0x410   :  { %510 = vrot.lane.b32.xlu1 %v508_v38, %s854_s2 }
 0x414   :  { %512 = vrot.lane.b32.xlu1 %v509_v46, %s854_s2  ;;  %v495_v46 = vrot.slane %v1083_v63, %v490_v7 }
 0x418   :  { %539 = vrot.lane.b32.xlu1 %v537_v50, %s855_s7 }
 0x41c   :  { %568 = vrot.lane.b32.xlu1 %v566_v52, %s857_s10  ;;  %v496_v52 = vmul.f32 %v491_v30, %v1029_v15 }
 0x420   :  { %597 = vrot.lane.b32.xlu1 %v595_v54, %s858_s12 }
 0x462   :  { %v371_v37 = vpop.permute.xlu1 %370  ;;  %v542_v32 = vpop.permute.xlu0 %541 }
 0x466   :  { %v373_v55 = vpop.permute.xlu1 %372  ;;  %v571_v15 = vpop.permute.xlu0 %570 }
 0x467   :  { %v377_v11 = vsel %vm376_vm12, %v371_v37, %v373_v55  ;;  %v378_v12 = vsel %vm376_vm12, %v373_v55, %v371_v37  ;;  %v549_v55 = vrot.slane %v1081_v62, %v548_v31 }
 0x468   :  { %v387_v26 = vmul.f32 %v382_v4, %v378_v12  ;;  %v388_v27 = vmul.f32 %v386_v8, %v377_v11  ;;  %v695_v11 = vld [vmem:[#allocation9 + $0x10] ss:$0 sm:$0xff]  ;;  %v696_v12 = vld [vmem:[#allocation9 + $0x18] ss:$0 sm:$0xff] }
 0x46a   :  { %v402_v41 = vpop.permute.xlu1 %401 }
 0x46e   :  { %v404_v56 = vpop.permute.xlu1 %403 }
 0x46f   :  { %v406_v5 = vsel %vm405_vm11, %v402_v41, %v404_v56  ;;  %v407_v6 = vsel %vm405_vm11, %v404_v56, %v402_v41  ;;  %v553_v41 = vrot.slane %v1083_v63, %v548_v31 }
 0x470   :  { %v416_v17 = vmul.f32 %v411_v0, %v407_v6  ;;  %v417_v18 = vmul.f32 %v415_v1, %v406_v5  ;;  %v582_v0 = vrot.slane %v1083_v63, %v577_v39 }
 0x472   :  { %v431_v58 = vpop.permute.xlu1 %430  ;;  %v418_v35 = vadd.f32 %v416_v17, %v387_v26  ;;  %v419_v36 = vadd.f32 %v417_v18, %v388_v27 }
 0x476   :  { %v433_v60 = vpop.permute.xlu1 %432 }
 0x477   :  { %v435_v13 = vsel %vm434_vm13, %v431_v58, %v433_v60  ;;  %v436_v14 = vsel %vm434_vm13, %v433_v60, %v431_v58  ;;  %v497_v58 = vmul.f32 %v495_v46, %v1031_v16 }
 0x478   :  { %v445_v28 = vmul.f32 %v440_v9, %v436_v14  ;;  %v446_v29 = vmul.f32 %v444_v10, %v435_v13  ;;  %v600_v13 = vpop.permute.xlu0 %599 }
 0x47a   :  { %v460_v53 = vpop.permute.xlu1 %459  ;;  %v447_v50 = vadd.f32 %v445_v28, %v418_v35  ;;  %v448_v51 = vadd.f32 %v446_v29, %v419_v36 }
 0x47e   :  { %v462_v3 = vpop.permute.xlu1 %461 }
 0x47f   :  { %v464_v22 = vsel %vm463_vm14, %v460_v53, %v462_v3  ;;  %v465_v24 = vsel %vm463_vm14, %v462_v3, %v460_v53 }
 0x480   :  { %v474_v38 = vmul.f32 %v469_v19, %v465_v24  ;;  %v475_v43 = vmul.f32 %v473_v20, %v464_v22 }
 0x482   :  { %v511_v21 = vpop.permute.xlu1 %510  ;;  %v476_v54 = vadd.f32 %v474_v38, %v447_v50  ;;  %v477_v37 = vadd.f32 %v475_v43, %v448_v51 }
 0x484   :  { %v498_v1 = vadd.f32 %v496_v52, %v476_v54  ;;  %v499_v2 = vadd.f32 %v497_v58, %v477_v37 }
 0x486   :  { %v513_v45 = vpop.permute.xlu1 %512 }
 0x487   :  { %v515_v42 = vsel %vm514_vm15, %v511_v21, %v513_v45  ;;  %v516_v23 = vsel %vm514_vm15, %v513_v45, %v511_v21 }
 0x488   :  { %v525_v48 = vmul.f32 %v520_v47, %v515_v42  ;;  %v526_v53 = vmul.f32 %v524_v49, %v516_v23 }
 0x48a   :  { %v540_v56 = vpop.permute.xlu1 %539  ;;  %v527_v16 = vadd.f32 %v525_v48, %v498_v1  ;;  %v528_v8 = vadd.f32 %v526_v53, %v499_v2 }
 0x48b   :  { %v544_v59 = vsel %vm543_vm0, %v540_v56, %v542_v32  ;;  %v545_v60 = vsel %vm543_vm0, %v542_v32, %v540_v56 }
 0x48c   :  { %v554_v3 = vmul.f32 %v549_v55, %v544_v59  ;;  %v555_v4 = vmul.f32 %v553_v41, %v545_v60 }
 0x48e   :  { %v569_v5 = vpop.permute.xlu1 %568  ;;  %v556_v14 = vadd.f32 %v554_v3, %v527_v16  ;;  %v557_v62 = vadd.f32 %v555_v4, %v528_v8 }
 0x48f   :  { %v573_v6 = vsel %vm572_vm1, %v569_v5, %v571_v15  ;;  %v574_v7 = vsel %vm572_vm1, %v571_v15, %v569_v5 }
 0x490   :  { %v583_v9 = vmul.f32 %v578_v57, %v573_v6  ;;  %v584_v10 = vmul.f32 %v582_v0, %v574_v7 }
 0x492   :  { %v598_v17 = vpop.permute.xlu1 %597  ;;  %v585_v19 = vadd.f32 %v583_v9, %v556_v14  ;;  %v586_v20 = vadd.f32 %v584_v10, %v557_v62 }
 0x493   :  { %v602_v63 = vsel %vm601_vm2, %v598_v17, %v600_v13  ;;  %v603_v18 = vsel %vm601_vm2, %v600_v13, %v598_v17 }
 0x494   :  { %v612_v21 = vmul.f32 %v695_v11, %v602_v63  ;;  %v613_v22 = vmul.f32 %v696_v12, %v603_v18 }
 0x496   :  { %v614_v24 = vadd.f32 %v612_v21, %v585_v19  ;;  %v615_v25 = vadd.f32 %v613_v22, %v586_v20 }
 0x498   :  { %v618_v26 = vadd.f32 %v617_v61, %v614_v24  ;;  %v619_v27 = vadd.f32 %v617_v61, %v615_v25 }
 0x49a   :  { %v697_v28 = vmul.f32 -1.442695, %v618_v26  ;;  %v698_v29 = vmul.f32 -1.442695, %v619_v27 }
 0x49c   :  { %736 = vpow2.f32 %v697_v28 }
 0x49d   :  { %738 = vpow2.f32 %v698_v29 }
 0x4a9   :  { %v737_v30 = vpop.eup %736 }
 0x4aa   :  { %v739_v31 = vpop.eup %738  ;;  %v626_v32 = vadd.f32 1.0, %v737_v30 }
 0x4ab   :  { %v627_v35 = vadd.f32 1.0, %v739_v31 }
 0x4ac   :  { %740 = vrcp.f32 %v626_v32 }
 0x4ad   :  { %742 = vrcp.f32 %v627_v35 }
 0x4b9   :  { %v741_v36 = vpop.eup %740 }
 0x4ba   :  { %v743_v38 = vpop.eup %742  ;;  %v635_v43 = vrot.slane %v741_v36, %v1077_v44  ;;  %v645_v45 = vrot.slane %v741_v36, %v1074_v40 }
 0x4bb   :  { %v639_v46 = vrot.slane %v743_v38, %v1077_v44  ;;  %v649_v47 = vrot.slane %v743_v38, %v1074_v40 }
 0x4bc   :  { %v640_v49 = vmul.f32 %v635_v43, %v918_v33  ;;  %v650_v50 = vmul.f32 %v645_v45, %v918_v33 }
 0x4bd   :  { %v641_v51 = vmul.f32 %v639_v46, %v920_v34  ;;  %v651_v39 = vmul.f32 %v649_v47, %v920_v34 }
 0x4be   :  { %v652_v52 = vsel %vm97_vm4, %v640_v49, %v650_v50 }
 0x4bf   :  { %v653_v42 = vsel %vm97_vm4, %v641_v51, %v651_v39  ;;  %654 = vst [vmem:[#allocation11] sm:$0xff] %v652_v52 }
 0x4c0   :  { %655 = vst [vmem:[#allocation11 + $0x8] sm:$0xff] %v653_v42 }
 0x4c1   :  { %827 = shalt.err (!%p824_p10)
}
 0x4c2   :  { %665 = dma.vmem_to_hbm [thread:$0]  %s663_s16, 256, %s1145_s6, [#allocation5]  }
 0x4c3   :  { %842 = dma.done.wait [#allocation5], 256  }
 0x4c4   :  { %843 = vsyncadd [#allocation5], 4294967040 }
 0x4c5   :  { %669 = vsyncpa [#allocation4], 1 }
 0x4c6   :  { %670 = vsyncpa [#allocation8], 1 }
 0x4c7   :  { %671 = vsyncpa [#allocation5], 1 }
 0x4c8   :  { %672 = vsyncpa [#allocation6], 1 }

</bundles_post_ra>
